<compile_context>
chip_gen: v7x
topology: tpu7x:2x2x1
jax: 0.10.0
libtpu: 0.0.40
codegen_flags: <defaults>
</compile_context>

<pallas_src>
import functools

import jax
import jax.numpy as jnp
from jax import lax
from jax.experimental import pallas as pl
from jax.experimental.pallas import tpu as pltpu


def _round_up(x, m):
    return (x + m - 1) // m * m


def zeroshot_clip_kernel(x_ref, w_ref, t_ref, o_ref, acc_ref):
    # x_ref: [bt, tk] flattened-image tile (original dtype; cast here)
    # w_ref: [tk, D]  bf16 image-encoder projection tile
    # t_ref: [D, Kp]  bf16 logit_scale-folded, transposed, K-padded text feats
    # o_ref: [bt, Kp] f32  logits tile
    # acc_ref: [bt, D] f32 accumulator scratch (persists across the F axis)
    k = pl.program_id(1)

    @pl.when(k == 0)
    def _init():
        acc_ref[...] = jnp.zeros_like(acc_ref)

    # 1) encode_image (partial): bf16 MXU matmul, f32 accumulation.
    x = x_ref[...].astype(jnp.bfloat16)
    w = w_ref[...].astype(jnp.bfloat16)
    acc_ref[...] += jnp.dot(x, w, preferred_element_type=jnp.float32)

    # 2) + 3) epilogue on the last F tile only: normalize, classify, store.
    @pl.when(k == pl.num_programs(1) - 1)
    def _finalize():
        feats = acc_ref[...]
        sq = jnp.sum(feats * feats, axis=-1, keepdims=True)
        # max(sq, 1e-24) under sqrt == max(||x||, 1e-12) -> matches F.normalize
        feats = feats * lax.rsqrt(jnp.maximum(sq, 1e-24))
        # logit_scale is pre-folded into t_ref (constant per model).
        o_ref[...] = jnp.dot(feats.astype(jnp.bfloat16), t_ref[...],
                             preferred_element_type=jnp.float32
                             ).astype(o_ref.dtype)


@functools.partial(jax.jit, static_argnames=("bt", "tk"))
def zeroshot_clip_forward(image_nchw, w_img, text_features, logit_scale,
                          *, bt=128, tk=2048):
    """image_nchw: [B,C,H,W]; w_img: [C*H*W, D] (bf16 preferred);
    text_features: [K, D] (L2-normalized)."""
    B = image_nchw.shape[0]
    F_dim, D = w_img.shape
    K = text_features.shape[0]

    # ---- init-time prep (constants per model: init_text_features path) ----
    Kp = _round_up(K, 128)                                      # lane-dense N
    t = (jnp.asarray(logit_scale, jnp.float32)
         * text_features.astype(jnp.float32)).T                 # [D, K]
    t = jnp.pad(t, ((0, 0), (0, Kp - K))).astype(jnp.bfloat16)  # [D, Kp] bf16

    # ---- tile selection -----------------------------------------------------
    # Batch tile: as large as possible (amortizes the weight stream, fills the
    # MXU M dim) but no larger than the (8-rounded) batch.
    bt = max(8, min(bt, _round_up(B, 8)))
    # v7x megacore: if the batch would form a single parallel tile but can be
    # split, halve bt so both TensorCores get work (no-op for small B).
    if B > 8 and _round_up(B, bt) // bt < 2:
        bt = _round_up(pl.cdiv(B, 2), 8)
    Bp = _round_up(B, bt)

    # F tile: largest multiple of 128 that divides the (128-rounded) feature
    # dim and is <= the requested tk -> per-step DMA >> per-step overhead, and
    # (for 128-aligned F) no per-call pad copy of the weight.
    Fp = _round_up(F_dim, 128)
    tk_req = max(128, min(_round_up(tk, 128), Fp))
    tk = 128
    cand = 128
    while cand <= tk_req:
        if Fp % cand == 0:
            tk = cand
        cand += 128

    # ---- per-call prep (no dtype-materialization passes over x / w) --------
    x = image_nchw.reshape(B, -1)                               # [B, F] orig dtype
    if Bp != B:
        x = jnp.pad(x, ((0, Bp - B), (0, 0)))
    w = w_img                                                   # bf16 as stored
    if Fp != F_dim:
        # TODO(synk): with a non-128-aligned feature dim this pads the full
        # weight per call; in a real deployment pad w once at model init.
        x = jnp.pad(x, ((0, 0), (0, Fp - F_dim)))
        w = jnp.pad(w, ((0, Fp - F_dim), (0, 0)))

    grid = (Bp // bt, Fp // tk)
    n_batch_tiles = grid[0]

    x_itemsize = jnp.dtype(x.dtype).itemsize
    w_itemsize = jnp.dtype(w.dtype).itemsize

    # Weight is re-streamed once per batch tile -> count it in bytes_accessed.
    cost = pl.CostEstimate(
        flops=2 * Bp * Fp * D + 2 * Bp * D * Kp,
        transcendentals=Bp,                               # rsqrt per batch row
        bytes_accessed=(x.size * x_itemsize
                        + w.size * w_itemsize * n_batch_tiles
                        + t.size * 2
                        + Bp * Kp * 4),
    )

    # Double-buffered tiles + resident text + accumulator, with headroom.
    vmem_needed = (2 * bt * tk * x_itemsize        # x tile (double-buffered)
                   + 2 * tk * D * w_itemsize       # w tile
                   + 2 * D * Kp * 2                # resident text (bf16)
                   + 2 * bt * Kp * 4               # output tile
                   + bt * D * 4)                   # f32 accumulator
    vmem_limit = int(min(max(2 * vmem_needed, 32 * 1024 * 1024),
                         48 * 1024 * 1024))

    logits_padded = pl.pallas_call(
        zeroshot_clip_kernel,
        out_shape=jax.ShapeDtypeStruct((Bp, Kp), jnp.float32),
        grid_spec=pltpu.PrefetchScalarGridSpec(
            num_scalar_prefetch=0,
            grid=grid,
            in_specs=[
                pl.BlockSpec((bt, tk), lambda i, k: (i, k)),   # image tile
                pl.BlockSpec((tk, D), lambda i, k: (k, 0)),    # weight tile
                pl.BlockSpec((D, Kp), lambda i, k: (0, 0)),    # text (resident)
            ],
            out_specs=pl.BlockSpec((bt, Kp), lambda i, k: (i, 0)),
            scratch_shapes=[pltpu.VMEM((bt, D), jnp.float32)],
        ),
        compiler_params=pltpu.CompilerParams(
            dimension_semantics=("parallel", "arbitrary"),
            vmem_limit_bytes=vmem_limit),
        cost_estimate=cost,
    )(x, w, t)

    return logits_padded[:B, :K]


if __name__ == "__main__":
    # Small, deterministic shapes consistent with the forward pass.
    B, C, H, W = 16, 4, 16, 16         # image batch, NCHW
    F_DIM = C * H * W                  # flattened image features = 1024
    D = 128                            # CLIP embedding dim
    K = 16                             # number of class prompts

    key = jax.random.PRNGKey(0)
    k_img, k_w, k_txt = jax.random.split(key, 3)

    image = jax.random.normal(k_img, (B, C, H, W), dtype=jnp.float32)

    # Deterministic "image encoder" parameters (linear stand-in for ViT),
    # stored in bf16 so the bandwidth-bound weight stream is halved.
    w_img = (jax.random.normal(k_w, (F_DIM, D), dtype=jnp.float32) * 0.02
             ).astype(jnp.bfloat16)

    # init_text_features: encode prompts then F.normalize(dim=-1) — synthesized.
    text_raw = jax.random.normal(k_txt, (K, D), dtype=jnp.float32)
    text_features = text_raw / jnp.maximum(
        jnp.linalg.norm(text_raw, axis=-1, keepdims=True), 1e-12
    )

    # CLIP: logit_scale = exp(ln(1/0.07))
    logit_scale = float(jnp.exp(jnp.log(1.0 / 0.07)))

    # tk=512 so the demo exercises 2 F-accumulation steps and 2 batch tiles.
    logits = zeroshot_clip_forward(image, w_img, text_features, logit_scale,
                                   tk=512)
    jax.block_until_ready(logits)

    # Reference in plain JAX (same bf16-quantized operands, f32 accumulation).
    x_f32 = image.reshape(B, -1).astype(jnp.bfloat16).astype(jnp.float32)
    w_f32 = w_img.astype(jnp.float32)
    feats_ref = x_f32 @ w_f32
    feats_ref = feats_ref / jnp.maximum(
        jnp.linalg.norm(feats_ref, axis=-1, keepdims=True), 1e-12
    )
    t_mat = (logit_scale * text_features).T.astype(jnp.bfloat16
                                                   ).astype(jnp.float32)
    ref = feats_ref.astype(jnp.bfloat16).astype(jnp.float32) @ t_mat

    assert logits.shape == (B, K)
    assert jnp.allclose(logits, ref, atol=5e-2, rtol=5e-2), (
        "max abs err = %g" % float(jnp.max(jnp.abs(logits - ref))))

    print("KERNEL_OK")
</pallas_src>

<mosaic_0001>
module attributes {stable_mosaic.version = 11 : i64} {
  func.func @zeroshot_clip_kernel(%arg0: i32, %arg1: i32, %arg2: memref<8x512xf32, #tpu.memory_space<vmem>>, %arg3: memref<512x128xbf16, #tpu.memory_space<vmem>>, %arg4: memref<128x128xbf16, #tpu.memory_space<vmem>>, %arg5: memref<8x128xf32, #tpu.memory_space<vmem>>, %arg6: memref<8x128xf32, #tpu.memory_space<vmem>>) attributes {dimension_semantics = [#tpu.dimension_semantics<parallel>, #tpu.dimension_semantics<arbitrary>], iteration_bounds = array<i64: 2, 2>, scalar_prefetch = 0 : i64, scratch_operands = 1 : i64, tpu.core_type = #tpu.core_type<tc>, window_params = [{transform_indices = @transform_0, window_bounds = array<i64: 8, 512>}, {transform_indices = @transform_1, window_bounds = array<i64: 512, 128>}, {pipeline_mode = #tpu.pipeline_mode<synchronous>, transform_indices = @transform_2, window_bounds = array<i64: 128, 128>}, {transform_indices = @transform_3, window_bounds = array<i64: 8, 128>}]} {
    %c0_i32 = arith.constant 0 : i32
    %0 = arith.cmpi eq, %arg1, %c0_i32 : i32
    %1 = arith.extui %0 : i1 to i32
    %c0_i32_0 = arith.constant 0 : i32
    %2 = arith.cmpi ne, %1, %c0_i32_0 : i32
    scf.if %2 {
      %cst_9 = arith.constant 0.000000e+00 : f32
      %13 = vector.broadcast %cst_9 : f32 to vector<8x128xf32>
      %c0_10 = arith.constant 0 : index
      %c0_11 = arith.constant 0 : index
      %14 = vector.load %arg6[%c0_10, %c0_11] : memref<8x128xf32, #tpu.memory_space<vmem>>, vector<8x128xf32>
      tpu.vector_store %arg6[%c0_10, %c0_11], %13 {strides = array<i32>} : memref<8x128xf32, #tpu.memory_space<vmem>>, vector<8x128xf32>,
    } else {
    }
    %c0 = arith.constant 0 : index
    %c0_1 = arith.constant 0 : index
    %3 = vector.load %arg2[%c0, %c0_1] : memref<8x512xf32, #tpu.memory_space<vmem>>, vector<8x512xf32>
    %4 = arith.truncf %3 : vector<8x512xf32> to vector<8x512xbf16>
    %c0_2 = arith.constant 0 : index
    %c0_3 = arith.constant 0 : index
    %5 = vector.load %arg3[%c0_2, %c0_3] : memref<512x128xbf16, #tpu.memory_space<vmem>>, vector<512x128xbf16>
    %c0_4 = arith.constant 0 : index
    %c0_5 = arith.constant 0 : index
    %6 = vector.load %arg6[%c0_4, %c0_5] : memref<8x128xf32, #tpu.memory_space<vmem>>, vector<8x128xf32>
    %cst = arith.constant dense<0.000000e+00> : vector<8x128xf32>
    %7 = tpu.matmul %4, %5, %cst {dimension_numbers = #tpu.dot_dimension_numbers<[1], [0], [0], [1], [0, 0, 1, 1], [], []>} : vector<8x512xbf16>, vector<512x128xbf16>, vector<8x128xf32> -> vector<8x128xf32>
    %8 = arith.addf %6, %7 : vector<8x128xf32>
    %c0_6 = arith.constant 0 : index
    %c0_7 = arith.constant 0 : index
    %9 = vector.load %arg6[%c0_6, %c0_7] : memref<8x128xf32, #tpu.memory_space<vmem>>, vector<8x128xf32>
    tpu.vector_store %arg6[%c0_6, %c0_7], %8 {strides = array<i32>} : memref<8x128xf32, #tpu.memory_space<vmem>>, vector<8x128xf32>,
    %c1_i32 = arith.constant 1 : i32
    %10 = arith.cmpi eq, %arg1, %c1_i32 : i32
    %11 = arith.extui %10 : i1 to i32
    %c0_i32_8 = arith.constant 0 : i32
    %12 = arith.cmpi ne, %11, %c0_i32_8 : i32
    scf.if %12 {
      %c0_9 = arith.constant 0 : index
      %c0_10 = arith.constant 0 : index
      %13 = vector.load %arg6[%c0_9, %c0_10] : memref<8x128xf32, #tpu.memory_space<vmem>>, vector<8x128xf32>
      %14 = arith.mulf %13, %13 : vector<8x128xf32>
      %cst_11 = arith.constant dense<0.000000e+00> : vector<8xf32>
      %15 = vector.multi_reduction <add>, %14, %cst_11 [1] : vector<8x128xf32> to vector<8xf32>
      %16 = vector.shape_cast %15 : vector<8xf32> to vector<8x1xf32>
      %cst_12 = arith.constant 1.000000e-24 : f32
      %17 = vector.broadcast %cst_12 : f32 to vector<8x1xf32>
      %18 = arith.maximumf %16, %17 : vector<8x1xf32>
      %19 = math.rsqrt %18 : vector<8x1xf32>
      %20 = vector.broadcast %19 : vector<8x1xf32> to vector<8x128xf32>
      %21 = arith.mulf %13, %20 : vector<8x128xf32>
      %22 = arith.truncf %21 : vector<8x128xf32> to vector<8x128xbf16>
      %c0_13 = arith.constant 0 : index
      %c0_14 = arith.constant 0 : index
      %23 = vector.load %arg4[%c0_13, %c0_14] : memref<128x128xbf16, #tpu.memory_space<vmem>>, vector<128x128xbf16>
      %cst_15 = arith.constant dense<0.000000e+00> : vector<8x128xf32>
      %24 = tpu.matmul %22, %23, %cst_15 {dimension_numbers = #tpu.dot_dimension_numbers<[1], [0], [0], [1], [0, 0, 1, 1], [], []>} : vector<8x128xbf16>, vector<128x128xbf16>, vector<8x128xf32> -> vector<8x128xf32>
      %c0_16 = arith.constant 0 : index
      %c0_17 = arith.constant 0 : index
      %25 = vector.load %arg5[%c0_16, %c0_17] : memref<8x128xf32, #tpu.memory_space<vmem>>, vector<8x128xf32>
      tpu.vector_store %arg5[%c0_16, %c0_17], %24 {strides = array<i32>} : memref<8x128xf32, #tpu.memory_space<vmem>>, vector<8x128xf32>,
    } else {
    }
    return
  }
  func.func @transform_0(%arg0: i32, %arg1: i32) -> (i32, i32) {
    %c0_i32 = arith.constant 0 : i32
    return %arg0, %arg1 : i32, i32
  }
  func.func @transform_1(%arg0: i32, %arg1: i32) -> (i32, i32) {
    %c0_i32 = arith.constant 0 : i32
    %c0_i32_0 = arith.constant 0 : i32
    return %arg1, %c0_i32 : i32, i32
  }
  func.func @transform_2(%arg0: i32, %arg1: i32) -> (i32, i32) {
    %c0_i32 = arith.constant 0 : i32
    %c0_i32_0 = arith.constant 0 : i32
    %c0_i32_1 = arith.constant 0 : i32
    return %c0_i32, %c0_i32_0 : i32, i32
  }
  func.func @transform_3(%arg0: i32, %arg1: i32) -> (i32, i32) {
    %c0_i32 = arith.constant 0 : i32
    %c0_i32_0 = arith.constant 0 : i32
    return %arg0, %c0_i32 : i32, i32
  }
}

</mosaic_0001>

<bundles_post_ra>
// kernel: zeroshot_clip_forward.1
= control target key start
LH: loop header
LB: loop body
LE: loop exit
PB: predicated region body
PF: predicated region fallthrough
CT: control target
= control target key end

     0   :  { %8 = vsyncpa [#allocation4], 0  ;;  %s1365_s0 = inlined_call_operand.vmem [shape: f32[16,1024], index: 0, kind: input, shape index: {}]   ;;  %s1366_s1 = inlined_call_operand.vmem [shape: bf16[1024,128], index: 1, kind: input, shape index: {}]   ;;  %s1367_s2 = inlined_call_operand.vmem [shape: bf16[128,128], index: 2, kind: input, shape index: {}]   ;;  %s1368_s3 = inlined_call_operand.hbm [shape: f32[16,128], index: 3, kind: output, shape index: {}]  }
   0x1   :  { %10 = vsyncpa [#allocation4 + $0x1], 0  ;;  %s1157_s12 = smov 0   ;;  %s1159_s13 = smov 0  }
   0x2   :  { %s1161_s14 = smov 0   ;;  %s1163_s15 = smov 0  }
   0x3   :  { %s1165_s16 = smov 0   ;;  %s1167_s17 = smov 0  }
   0x4   :  { %s1169_s18 = smov 0   ;;  %s1171_s19 = smov 0  }
   0x5 LB: > { %s791_s20 = sadd.s32 4294967295, %s1131_s19   ;;  %s792_s21 = sadd.s32 4294967294, %s1131_s19   ;;  %s1131_s19 = sphi %s1171_s19, %s16_s19   ;;  %s1127_s18 = sphi %s1169_s18, %s1382_s18   ;;  %s1123_s17 = sphi %s1167_s17, %s1381_s17   ;;  %s1119_s16 = sphi %s1165_s16, %s1380_s16   ;;  %s1115_s15 = sphi %s1163_s15, %s1379_s15   ;;  %s1111_s14 = sphi %s1161_s14, %s1378_s14   ;;  %s1107_s13 = sphi %s1159_s13, %s1377_s13   ;;  %s1103_s12 = sphi %s1157_s12, %s1376_s12  }
   0x6   : > { %s25_s22 = sadd.s32 1, %s1123_s17  ;;  %s28_s23 = sadd.s32 1, %s1127_s18 }
   0x7   : > { %p26_p0 = scmp.ge.s32.totalorder %s25_s22, 2  ;;  %p120_p1 = scmp.ne.s32.totalorder %s1111_s14, %s1107_s13 }
   0x8   : > { %p121_p2 = scmp.eq.s32.totalorder %s791_s20, 3  ;;  %p126_p4 = scmp.ne.s32.totalorder %s1107_s13, %s1103_s12 }
   0x9   : > { %s1384_s22 = smov (%p26_p0, %s25_s22), 0  ;;  %s1386_s23 = smov (!%p26_p0, %s28_s23), %s1127_s18 }
   0xa   : > { %p1206_p3 = por %p121_p2, %p120_p1  ;;  %p30_p5 = scmp.ge.s32.totalorder %s1386_s23, 2 }
   0xb   : > { %p127_p6 = scmp.eq.s32.totalorder %s792_s21, 3  ;;  %p795_p7 = scmp.ge.s32.totalorder %s1131_s19, 1 }
   0xc   : > { %p170_p8 = scmp.lt.s32.totalorder %s1131_s19, 5  ;;  %s1388_s23 = smov (%p30_p5, %s1386_s23), 0 }
   0xd   : > { %1372 = sst [smem:[#allocation6_spill]] %s1388_s23  ;;  %p1216_p9 = por %p127_p6, %p126_p4 }
   0xe   : > { %p171_p10 = pnand %p795_p7, %p170_p8  ;;  %s107_s26 = ssub.s32 %s1127_s18, %s1388_s23 }
   0xf   : > { %s110_s27 = sadd.s32 1, %s1111_s14  ;;  %p108_p11 = scmp.eq.s32.totalorder %s107_s26, 0 }
  0x10   : > { %174 = sbr.rel (%p171_p10) target bundleno = 697 (0x2b9), region = 32  ;;  %s1369_s29 = sand.u32 (!%p171_p10), 1, %s1107_s13  }
  0x11   : > { %s1224_s28 = scalar_select %p108_p11, %s1111_s14, %s110_s27  }
  0x12   : > { %s797_s30 = sshll.u32 (!%p171_p10), %s1115_s15, 2  ;;  %s1230_s4 = sshll.u32 (!%p171_p10), %s1369_s29, 3 }
  0x13   : > { %p204_p12 = scmp.lt.s32.totalorder (!%p171_p10), %s1119_s16, 1  ;;  %p206_p13 = scmp.lt.s32.totalorder (!%p171_p10), %s797_s30, 7 }
  0x14   : > { %s800_s7 = sshll.u32 (!%p171_p10), %s1115_s15, 6  ;;  %s202_s23 = scalar_lea.vmem (!%p171_p10), [#allocation3], %s1230_s4 }
  0x15   : > { %p214_p0 = scmp.lt.s32.totalorder (!%p171_p10), %s800_s7, 127  ;;  %p802_p1 = scmp.ne.s32.totalorder (!%p171_p10), %s1115_s15, 0 }
  0x17   : > { %s205_s5 = scalar_select %p204_p12, %s1119_s16, 1 }
  0x18   : > { %s1390_s30 = smov (!%p206_p13, %s797_s30), 7  ;;  %s1392_s7 = smov (!%p214_p0, %s800_s7), 127 }
  0x19   : > { %s798_s6 = sshll.u32 %s205_s5, 3  ;;  %s801_s21 = sshll.u32 %s1392_s7, 2  ;;  %v1133_v0 = vmov (!%p802_p1), 0.0  }
  0x1a   : > { %s209_s8 = sadd.s32 %s798_s6, %s1390_s30  ;;  %s1243_s29 = scalar_lea.vmem %s1366_s1, %s801_s21  ;;  %224 = vst [vmem:[#allocation2] sm:$0xff] (!%p802_p1), %v1133_v0 }
  0x1b   : > { %s799_s9 = sshll.u32 %s209_s8, 3  ;;  %223 = sbr.rel (%p802_p1) target bundleno = 34 (0x22), region = 36 }
  0x1c   : > { %s1238_s20 = scalar_lea.vmem %s1365_s0, %s799_s9 }
  0x22 PF: > { %v995_v1 = vld [vmem:[%s1243_s29 + $0x40] sm:$0xff]   ;;  %v999_v5 = vld [vmem:[%s1243_s29 + $0x48] sm:$0xff]   ;;  %v1003_v9 = vld [vmem:[%s1243_s29 + $0x50] sm:$0xff]   ;;  %p835_p2 = scmp.ne.s32.totalorder %s1115_s15, 1 }
  0x23   : > { %v996_v2 = vld [vmem:[%s1243_s29 + $0xc0] sm:$0xff]   ;;  %848 = vmatprep.subr.bf16.mxu0 %v995_v1  ;;  %v1000_v6 = vld [vmem:[%s1243_s29 + $0xc8] sm:$0xff]   ;;  %v1004_v10 = vld [vmem:[%s1243_s29 + $0xd0] sm:$0xff]   ;;  %v1134_v56 = vmov (!%p835_p2), 0.0   ;;  %vm1135_vm0 = vmmov (!%p835_p2), 0  }
  0x24   : > { %v997_v3 = vld [vmem:[%s1243_s29] sm:$0xff]   ;;  %870 = vmatprep.subr.bf16.mxu1 %v996_v2  ;;  %v1001_v7 = vld [vmem:[%s1243_s29 + $0x8] sm:$0xff]   ;;  %v1005_v11 = vld [vmem:[%s1243_s29 + $0x10] sm:$0xff]  }
  0x25   : > { %v998_v4 = vld [vmem:[%s1243_s29 + $0x80] sm:$0xff]   ;;  %849 = vmatpush3.bf16.msra.mxu0 %v997_v3  ;;  %v1002_v8 = vld [vmem:[%s1243_s29 + $0x88] sm:$0xff]   ;;  %v1006_v12 = vld [vmem:[%s1243_s29 + $0x90] sm:$0xff]  }
  0x26   : > { %871 = vmatpush3.bf16.msra.mxu1 %v998_v4  ;;  %850 = vmatprep.subr.bf16.mxu0 %v999_v5  ;;  %v1007_v13 = vld [vmem:[%s1243_s29 + $0x58] sm:$0xff]   ;;  %v1011_v17 = vld [vmem:[%s1243_s29 + $0x60] sm:$0xff]   ;;  %v1015_v21 = vld [vmem:[%s1243_s29 + $0x68] sm:$0xff]  }
  0x27   : > { %872 = vmatprep.subr.bf16.mxu1 %v1000_v6  ;;  %v1008_v14 = vld [vmem:[%s1243_s29 + $0xd8] sm:$0xff]   ;;  %v1012_v18 = vld [vmem:[%s1243_s29 + $0xe0] sm:$0xff]   ;;  %v1016_v22 = vld [vmem:[%s1243_s29 + $0xe8] sm:$0xff]  }
  0x28   : > { %v1009_v15 = vld [vmem:[%s1243_s29 + $0x18] sm:$0xff]   ;;  %v1013_v19 = vld [vmem:[%s1243_s29 + $0x20] sm:$0xff]   ;;  %v1017_v23 = vld [vmem:[%s1243_s29 + $0x28] sm:$0xff]  }
  0x29   : > { %851 = vmatpush3.bf16.msra.mxu0 %v1001_v7  ;;  %v1010_v16 = vld [vmem:[%s1243_s29 + $0x98] sm:$0xff]   ;;  %v1014_v20 = vld [vmem:[%s1243_s29 + $0xa0] sm:$0xff]   ;;  %v1018_v24 = vld [vmem:[%s1243_s29 + $0xa8] sm:$0xff]  }
  0x2a   : > { %873 = vmatpush3.bf16.msra.mxu1 %v1002_v8  ;;  %852 = vmatprep.subr.bf16.mxu0 %v1003_v9  ;;  %v1019_v25 = vld [vmem:[%s1243_s29 + $0x70] sm:$0xff]   ;;  %v1023_v29 = vld [vmem:[%s1243_s29 + $0x78] sm:$0xff]   ;;  %v226_v33 = vld [vmem:[%s1238_s20 + $0x8] sm:$0xff] }
  0x2b   : > { %874 = vmatprep.subr.bf16.mxu1 %v1004_v10  ;;  %v1020_v26 = vld [vmem:[%s1243_s29 + $0xf0] sm:$0xff]   ;;  %v1024_v30 = vld [vmem:[%s1243_s29 + $0xf8] sm:$0xff]   ;;  %v225_v35 = vld [vmem:[%s1238_s20] sm:$0xff]  ;;  %v230_v36 = vpack.c.bf16 %v226_v33, %v226_v33 }
  0x2c   : > { %v1021_v27 = vld [vmem:[%s1243_s29 + $0x30] sm:$0xff]   ;;  %v1025_v31 = vld [vmem:[%s1243_s29 + $0x38] sm:$0xff]   ;;  %v229_v38 = vpack.c.bf16 %v225_v35, %v225_v35  ;;  %v297_v49 = vld [vmem:[#allocation2] sm:$0xff] }
  0x2d   : > { %853 = vmatpush3.bf16.msra.mxu0 %v1005_v11  ;;  %v1022_v28 = vld [vmem:[%s1243_s29 + $0xb0] sm:$0xff]   ;;  %v1026_v32 = vld [vmem:[%s1243_s29 + $0xb8] sm:$0xff]   ;;  %522 = vmatprep.mubr.bf16.mxu0 %v230_v36  ;;  %v1027_v57 = vld [vmem:[%s1367_s2] sm:$0xff] (!%p835_p2)  }
  0x2e   : > { %875 = vmatpush3.bf16.msra.mxu1 %v1006_v12  ;;  %854 = vmatprep.subr.bf16.mxu0 %v1007_v13  ;;  %v228_v34 = vld [vmem:[%s1238_s20 + $0x18] sm:$0xff]  ;;  %v227_v39 = vld [vmem:[%s1238_s20 + $0x10] sm:$0xff]  ;;  %v1028_v58 = vld [vmem:[%s1367_s2 + $0x8] sm:$0xff] (!%p835_p2)  }
  0x2f   : > { %876 = vmatprep.subr.bf16.mxu1 %v1008_v14  ;;  %v232_v37 = vpack.c.bf16 %v228_v34, %v228_v34  ;;  %v231_v40 = vpack.c.bf16 %v227_v39, %v227_v39  ;;  %v1029_v59 = vld [vmem:[%s1367_s2 + $0x10] sm:$0xff] (!%p835_p2)   ;;  %v1030_v60 = vld [vmem:[%s1367_s2 + $0x18] sm:$0xff] (!%p835_p2)   ;;  %v1031_v61 = vld [vmem:[%s1367_s2 + $0x20] sm:$0xff] (!%p835_p2)  }
  0x30   : > { %v1032_v62 = vld [vmem:[%s1367_s2 + $0x28] sm:$0xff] (!%p835_p2)   ;;  %v1033_v63 = vld [vmem:[%s1367_s2 + $0x30] sm:$0xff] (!%p835_p2)   ;;  %v1034_v0 = vld [vmem:[%s1367_s2 + $0x38] sm:$0xff] (!%p835_p2)  }
  0x31   : > { %855 = vmatpush3.bf16.msra.mxu0 %v1009_v15  ;;  %562 = vmatprep.mubr.bf16.mxu1 %v232_v37 }
  0x32   : > { %877 = vmatpush3.bf16.msra.mxu1 %v1010_v16  ;;  %856 = vmatprep.subr.bf16.mxu0 %v1011_v17 }
  0x33   : > { %878 = vmatprep.subr.bf16.mxu1 %v1012_v18 }
  0x35   : > { %857 = vmatpush3.bf16.msra.mxu0 %v1013_v19 }
  0x36   : > { %879 = vmatpush3.bf16.msra.mxu1 %v1014_v20  ;;  %858 = vmatprep.subr.bf16.mxu0 %v1015_v21 }
  0x37   : > { %880 = vmatprep.subr.bf16.mxu1 %v1016_v22 }
  0x39   : > { %859 = vmatpush3.bf16.msra.mxu0 %v1017_v23 }
  0x3a   : > { %881 = vmatpush3.bf16.msra.mxu1 %v1018_v24  ;;  %860 = vmatprep.subr.bf16.mxu0 %v1019_v25 }
  0x3b   : > { %882 = vmatprep.subr.bf16.mxu1 %v1020_v26 }
  0x3d   : > { %861 = vmatpush3.bf16.msra.mxu0 %v1021_v27 }
  0x3e   : > { %883 = vmatpush3.bf16.msra.mxu1 %v1022_v28  ;;  %862 = vmatprep.subr.bf16.mxu0 %v1023_v29 }
  0x3f   : > { %884 = vmatprep.subr.bf16.mxu1 %v1024_v30 }
  0x41   : > { %863 = vmatpush3.bf16.msra.mxu0 %v1025_v31 }
  0x42   : > { %885 = vmatpush3.bf16.msra.mxu1 %v1026_v32  ;;  %901 = vmatprep.subr.bf16.mxu0 (!%p835_p2), %v1134_v56 }
  0x44   : > { %523 = vmatmul.mubr.bf16.vlgmr.msra.gmra.mrb[0].mxu0 %v229_v38 }
  0x45   : > { %563 = vmatmul.mubr.bf16.vlgmr.msra.gmra.mrb[0].mxu1 %v231_v40  ;;  %902 = vmatpush3.bf16.msra.mxu0 (!%p835_p2), %v1027_v57 }
  0x46   : > { %903 = vmatprep.subr.bf16.mxu0 (!%p835_p2), %v1134_v56  ;;  %917 = vmatprep.mubr.msk.bf16.mxu0 (!%p835_p2), %vm1135_vm0, %v1134_v56 }
  0x49   : > { %904 = vmatpush3.bf16.msra.mxu0 (!%p835_p2), %v1028_v58 }
  0x4a   : > { %905 = vmatprep.subr.bf16.mxu0 (!%p835_p2), %v1134_v56 }
  0x4d   : > { %906 = vmatpush3.bf16.msra.mxu0 (!%p835_p2), %v1029_v59 }
  0x4e   : > { %907 = vmatprep.subr.bf16.mxu0 (!%p835_p2), %v1134_v56 }
  0x51   : > { %908 = vmatpush3.bf16.msra.mxu0 (!%p835_p2), %v1030_v60 }
  0x52   : > { %909 = vmatprep.subr.bf16.mxu0 (!%p835_p2), %v1134_v56 }
  0x55   : > { %910 = vmatpush3.bf16.msra.mxu0 (!%p835_p2), %v1031_v61 }
  0x56   : > { %911 = vmatprep.subr.bf16.mxu0 (!%p835_p2), %v1134_v56 }
  0x59   : > { %912 = vmatpush3.bf16.msra.mxu0 (!%p835_p2), %v1032_v62 }
  0x5a   : > { %913 = vmatprep.subr.bf16.mxu0 (!%p835_p2), %v1134_v56 }
  0x5d   : > { %914 = vmatpush3.bf16.msra.mxu0 (!%p835_p2), %v1033_v63 }
  0x5e   : > { %915 = vmatprep.subr.bf16.mxu0 (!%p835_p2), %v1134_v56 }
  0x61   : > { %916 = vmatpush3.bf16.msra.mxu0 (!%p835_p2), %v1034_v0 }
 0x117   : > { %v864_v41 = vpop.f32.mrb[0].mxu0 }
 0x118   : > { %v886_v42 = vpop.f32.mrb[0].mxu1  ;;  %v865_v43 = vpop.f32.mrb[1].mxu0 }
 0x119   : > { %v887_v44 = vpop.f32.mrb[1].mxu1  ;;  %v866_v45 = vadd.f32 %v865_v43, %v864_v41  ;;  %v867_v47 = vpop.f32.mrb[2].mxu0 }
 0x11a   : > { %v888_v46 = vadd.f32 %v887_v44, %v886_v42  ;;  %v889_v48 = vpop.f32.mrb[2].mxu1  ;;  %v868_v50 = vpop.f32.mrb[3].mxu0  ;;  %575 = sbr.rel (%p835_p2) target bundleno = 672 (0x2a0), region = 40 }
 0x11b   : > { %v890_v51 = vpop.f32.mrb[3].mxu1 }
 0x11c   : > { %v565_v52 = vadd.f32 %v888_v46, %v866_v45 }
 0x11e   : > { %v570_v53 = vadd.f32 %v565_v52, %v297_v49 }
 0x120   : > { %571 = vst [vmem:[#allocation2] sm:$0xff] %v570_v53 }
 0x127   : > { %v576_v54 = vld [vmem:[#allocation2] sm:$0xff] }
 0x128   : > { %v577_v55 = vmul.f32 %v576_v54, %v576_v54 }
 0x12a   : > { %578 = vadd.xlane.f32.xlu0 %v577_v55 }
 0x1b7   : > { %v579_v1 = vpop.xlane.xlu0 %578 }
 0x1b8   : > { %v580_v2 = vmax.f32 %v579_v1, 1e-24 }
 0x1ba   : > { %1035 = vrsqrt.f32 %v580_v2 }
 0x1c4   : > { %v1036_v3 = vpop.eup %1035 }
 0x1c5   : > { %v582_v4 = vmul.f32 %v1036_v3, %v576_v54 }
 0x1c7   : > { %v583_v5 = vpack.c.bf16 %v582_v4, %v582_v4 }
 0x1c9   : > { %918 = vmatmul.mubr.bf16.vlgmr.msra.gmra.mrb[0].mxu0 %v583_v5 }
 0x29c   : > { %v682_v6 = vpop.f32.mrb[0].mxu0 }
 0x29d   : > { %688 = vst [vmem:[%s202_s23] sm:$0xff] %v682_v6  ;;  %v919_v7 = vpop.f32.mrb[1].mxu0 }
 0x29e   : > { %v685_v8 = vpop.f32.mrb[2].mxu0 }
 0x29f   : > { %v920_v9 = vpop.f32.mrb[3].mxu0 }
 0x2a0 PF: > { %s845_s5 = sshll.u32 %s1119_s16, 7  ;;  %s703_s15 = sshll.u32 %s202_s23, 4  ;;  %s704_s15 = int_to_ptr.vmem [resolvable:$true] %s703_s15 }
 0x2a1   : > { %s1314_s8 = scalar_lea.hbm %s1368_s3, %s845_s5  ;;  %s1374_s9 = sand.u32 1, %s1107_s13  }
 0x2a2   : > { %s690_s10 = scalar_lea.sflag [#allocation4], %s1374_s9  ;;  %s1037_s11 = scalar_lea.vmem %s704_s15, 128 }
 0x2a3   : > { %p1038_p4 = scmp.ne.s32.totalorder %s704_s15, %s1037_s11  ;;  %s1136_s20 = smov [#allocation3]  }
 0x2a4   : > { %s1041_s21 = sshll.u32 %s1136_s20, 4  ;;  %s1042_s21 = int_to_ptr.vmem [resolvable:$false] %s1041_s21 }
 0x2a5   : > { %p1039_p5 = pnand %p1038_p4, %p1206_p3  ;;  %s1043_s26 = scalar_lea.vmem %s1042_s21, 256 }
 0x2a6   : > { %p1044_p7 = scmp.lt.s32.totalorder %s704_s15, %s1042_s21  ;;  %p1045_p8 = scmp.lt.s32.totalorder %s1043_s26, %s1037_s11 }
 0x2a7   : > { %p1040_p6 = pneg %p1039_p5 }
 0x2a8   : > { %p1046_p10 = por %p1045_p8, %p1044_p7 }
 0x2aa   : > { %p1047_p11 = pnand %p1046_p10, %p1040_p6 }
 0x2ac   : > { %1050 = shalt.err (!%p1047_p11)
}
 0x2ad   : > { %s1051_s16 = scalar_lea.hbm %s1314_s8, 128  ;;  %s1055_s27 = scalar_lea.hbm %s1368_s3, 256 }
 0x2ae   : > { %p1052_p12 = scmp.ne.s32.totalorder %s1314_s8, %s1051_s16  ;;  %p1056_p1 = scmp.lt.u32.totalorder %s1314_s8, %s1368_s3 }
 0x2af   : > { %p1057_p2 = scmp.lt.u32.totalorder %s1055_s27, %s1051_s16  ;;  %p1059_p5 = scmp.lt.u32.totalorder %s1051_s16, %s1314_s8 }
 0x2b0   : > { %p1053_p13 = pnand %p1052_p12, %p1206_p3 }
 0x2b1   : > { %p1058_p4 = por %p1057_p2, %p1056_p1 }
 0x2b2   : > { %p1054_p0 = pneg %p1053_p13 }
 0x2b3   : > { %p1060_p6 = por %p1059_p5, %p1058_p4 }
 0x2b5   : > { %p1061_p7 = pnand %p1060_p6, %p1054_p0 }
 0x2b7   : > { %1064 = shalt.err (!%p1061_p7)
}
 0x2b8   : > { %921 = dma.vmem_to_hbm [thread:$0]  (%p1206_p3), %s704_s15, 128, %s1314_s8, %s690_s10  }
 0x2b9 PF: > { %p927_p8 = scmp.ge.s32.totalorder %s1131_s19, 2  ;;  %s715_s5 = sand.u32 1, %s1103_s12  }
 0x2ba   : > { %s716_s6 = scalar_lea.sflag [#allocation4], %s715_s5 }
 0x2bb   : > { %p924_p10 = pnand %p927_p8, %p1216_p9 }
 0x2bd   : > { %1098 = dma.done.wait (!%p924_p10), %s716_s6, 128  }
 0x2be   : > { %1100 = vsyncadd (!%p924_p10), %s716_s6, 4294967168  ;;  %s16_s19 = sadd.s32 1, %s1131_s19   ;;  %s1375_s24 = sld [smem:[#allocation6_spill]] }
 0x2bf   : > { %p13_p11 = scmp.ge.s32.totalorder %s16_s19, 6   ;;  %s1376_s12 = smov %s1107_s13 }
 0x2c0   : > { %s1377_s13 = smov %s1111_s14  ;;  %s1378_s14 = smov %s1224_s28 }
 0x2c1   : > { %s1379_s15 = smov %s1123_s17  ;;  %s1380_s16 = smov %s1127_s18 }
 0x2c2   : > { %s1381_s17 = smov %s1384_s22  ;;  %15 = sbr.rel (!%p13_p11) target bundleno = 5 (0x5), region = 78 }
 0x2c4   : > { %s1382_s18 = smov %s1375_s24 }
 0x2c9   :  { %721 = vsyncpa [#allocation4], 1 }
 0x2ca   :  { %723 = vsyncpa [#allocation4 + $0x1], 1 }

</bundles_post_ra>
